<compile_context>
chip_gen: v7x
topology: tpu7x:2x2x1
jax: 0.10.0
libtpu: 0.0.40
codegen_flags: <defaults>
</compile_context>

<pallas_src>
import jax
import jax.numpy as jnp
from jax import lax
from jax.experimental import pallas as pl
from jax.experimental.pallas import tpu as pltpu


def _conv1x1_lrelu_kernel(x_ref, w_ref, b_ref, o_ref):
    # x_ref: (1, C_in, t)   activation tile, spatial axis on the lanes
    # w_ref: (C_out, C_in)  full weight, resident across the whole grid
    # b_ref: (C_out, 1)     f32 bias column
    # o_ref: (1, C_out, t)  output tile (lane-dense for t >= 128)
    acc = jnp.dot(w_ref[...], x_ref[0], preferred_element_type=jnp.float32)
    acc = acc + b_ref[...]                       # lane-broadcast of the bias
    # LeakyReLU(0.1): max(x, 0.1*x) == where(x >= 0, x, 0.1*x) for slope < 1.
    o_ref[0] = jnp.maximum(acc, 0.1 * acc).astype(o_ref.dtype)


def _select_tile(HW, N, t_hw):
    """Lane-aligned spatial tile with a megacore occupancy guard."""
    if HW <= 128:
        return HW                                 # full-extent block is always legal
    t = min(t_hw, HW)
    t = max(128, (t // 128) * 128)                # multiple of 128 (lane axis)
    # v7x has 2 TensorCores per chip; both grid axes are "parallel", so make
    # sure there are at least 2 grid points when the shape allows it.  The
    # extra grid step costs ~0.35 us on single-TC parts, negligible.
    while N * pl.cdiv(HW, t) < 2 and t > 128:
        t = max(128, ((t // 2) // 128) * 128)
    return t


def conv1x1_leaky_relu_nchw(x_nchw, w_oi, bias, *, t_hw=4096, out_dtype=None):
    """1x1 conv + LeakyReLU(0.1) on an NCHW tensor.

    x_nchw: (N, C_in, H, W)  f32 or bf16
    w_oi:   (C_out, C_in)    (PyTorch conv weight with the 1x1 dims squeezed)
    bias:   (C_out,)
    returns (N, C_out, H, W) in `out_dtype` (defaults to x dtype)
    """
    N, C_in, H, W = x_nchw.shape
    C_out = w_oi.shape[0]
    HW = H * W
    out_dtype = x_nchw.dtype if out_dtype is None else out_dtype

    # (N, C_in, H, W) -> (N, C_in, HW): trailing-dim reshape, no HBM transpose.
    x3 = x_nchw.reshape(N, C_in, HW)
    # Weight rides along in the activation dtype (bf16 path uses bf16 MXU);
    # bias/accumulation/activation stay f32.
    w = w_oi.astype(x_nchw.dtype)
    b2d = bias.astype(jnp.float32).reshape(C_out, 1)

    t = _select_tile(HW, N, t_hw)
    grid_hw = pl.cdiv(HW, t)          # ragged tail handled by Pallas block masking

    in_bytes = jnp.dtype(x_nchw.dtype).itemsize
    out_bytes = jnp.dtype(out_dtype).itemsize

    # Explicit scoped-VMEM budget: double-buffered x/out tiles + resident
    # weight/bias, ~50% headroom.  Clamped to [16 MiB, 32 MiB] which is safe on
    # every generation (v5e/v6e 128 MiB physical, v7x 64 MiB physical).
    tile_bytes = (2 * C_in * t * in_bytes
                  + 2 * C_out * t * out_bytes
                  + 2 * C_out * C_in * in_bytes
                  + 2 * C_out * 4)
    vmem_limit = int(min(max(tile_bytes * 1.5, 16 * 1024 * 1024),
                         32 * 1024 * 1024))

    cost = pl.CostEstimate(
        flops=2 * N * HW * C_in * C_out,
        transcendentals=0,
        bytes_accessed=N * HW * (C_in * in_bytes + C_out * out_bytes)
                       + C_in * C_out * in_bytes + C_out * 4,
    )

    out3 = pl.pallas_call(
        _conv1x1_lrelu_kernel,
        out_shape=jax.ShapeDtypeStruct((N, C_out, HW), out_dtype),
        grid_spec=pltpu.PrefetchScalarGridSpec(
            num_scalar_prefetch=0,
            grid=(N, grid_hw),
            in_specs=[
                pl.BlockSpec((1, C_in, t), lambda n, j: (n, 0, j)),
                pl.BlockSpec((C_out, C_in), lambda n, j: (0, 0)),
                pl.BlockSpec((C_out, 1), lambda n, j: (0, 0)),
            ],
            out_specs=pl.BlockSpec((1, C_out, t), lambda n, j: (n, 0, j)),
        ),
        compiler_params=pltpu.CompilerParams(
            dimension_semantics=("parallel", "parallel"),
            vmem_limit_bytes=vmem_limit,
        ),
        cost_estimate=cost,
    )(x3, w, b2d)

    return out3.reshape(N, C_out, H, W)


class DispnetContextEncoderPallas:
    """Mirror of rmvd DispnetContextEncoder: 1x1 conv (in_channels->32) + LeakyReLU(0.1)."""

    def __init__(self, in_channels=256, key=None):
        if key is None:
            key = jax.random.PRNGKey(0)
        k_w, k_b = jax.random.split(key)
        self.in_channels = in_channels
        self.out_channels = 32
        # Deterministic synthetic init matching PyTorch Conv2d default
        # (uniform(-1/sqrt(fan_in), 1/sqrt(fan_in)); kernel 1x1 => fan_in = C_in).
        bound = 1.0 / jnp.sqrt(jnp.float32(in_channels))
        w_oihw = jax.random.uniform(
            k_w, (self.out_channels, in_channels, 1, 1),
            minval=-bound, maxval=bound, dtype=jnp.float32)
        self.bias = jax.random.uniform(
            k_b, (self.out_channels,), minval=-bound, maxval=bound,
            dtype=jnp.float32)
        # (C_out, C_in, 1, 1) -> (C_out, C_in) matmul weight.
        self.w_oi = w_oihw[:, :, 0, 0]

    def __call__(self, conv3_nchw, *, t_hw=4096, out_dtype=None):
        N, C, H, W = conv3_nchw.shape
        assert C == self.in_channels
        return conv1x1_leaky_relu_nchw(conv3_nchw, self.w_oi, self.bias,
                                       t_hw=t_hw, out_dtype=out_dtype)


def _reference(x_nchw, w_oi, bias):
    y = jnp.einsum("oc,nchw->nohw", w_oi,
                   x_nchw.astype(jnp.float32),
                   precision=lax.Precision.HIGHEST)
    y = y + bias[None, :, None, None]
    return jnp.where(y >= 0, y, 0.1 * y)


if __name__ == "__main__":
    key = jax.random.PRNGKey(0)
    k_x, k_p, k_x2, k_x3 = jax.random.split(key, 4)

    # Small shapes consistent with the module (default in_channels=256).
    N, C_in, H, W = 2, 256, 8, 8
    x = jax.random.normal(k_x, (N, C_in, H, W), dtype=jnp.float32)

    model = DispnetContextEncoderPallas(in_channels=C_in, key=k_p)

    # 1) f32 path (exact parity with the PyTorch reference).
    out = jax.block_until_ready(model(x))
    ref = _reference(x, model.w_oi, model.bias)
    assert out.shape == (N, 32, H, W)
    assert jnp.allclose(out, ref, atol=1e-4, rtol=1e-4)

    # 2) Tiled path with a ragged spatial tail (HW=400, tile=256 -> 128 after
    #    the occupancy guard would not trigger since N*cdiv=2 already).
    x2 = jax.random.normal(k_x2, (1, C_in, 20, 20), dtype=jnp.float32)
    out2 = jax.block_until_ready(model(x2, t_hw=256))
    ref2 = _reference(x2, model.w_oi, model.bias)
    assert out2.shape == (1, 32, 20, 20)
    assert jnp.allclose(out2, ref2, atol=1e-4, rtol=1e-4)

    # 3) bf16 activation/weight read path (halves the dominant HBM read
    #    stream); accumulation stays f32, so tolerance is modest.  Shape chosen
    #    so the occupancy guard splits N=1 into >= 2 grid points.
    x3 = jax.random.normal(k_x3, (1, C_in, 16, 16), dtype=jnp.float32)
    out3 = jax.block_until_ready(model(x3.astype(jnp.bfloat16),
                                       out_dtype=jnp.float32))
    ref3 = _reference(x3.astype(jnp.bfloat16), model.w_oi, model.bias)
    assert out3.shape == (1, 32, 16, 16)
    assert jnp.allclose(out3, ref3, atol=2e-2, rtol=2e-2)

    print("KERNEL_OK")
</pallas_src>

<mosaic_0001>
module attributes {stable_mosaic.version = 11 : i64} {
  func.func @_conv1x1_lrelu_kernel(%arg0: i32, %arg1: i32, %arg2: memref<1x256x64xf32, #tpu.memory_space<vmem>>, %arg3: memref<32x256xf32, #tpu.memory_space<vmem>>, %arg4: memref<32x1xf32, #tpu.memory_space<vmem>>, %arg5: memref<1x32x64xf32, #tpu.memory_space<vmem>>) attributes {dimension_semantics = [#tpu.dimension_semantics<parallel>, #tpu.dimension_semantics<parallel>], iteration_bounds = array<i64: 2, 1>, scalar_prefetch = 0 : i64, scratch_operands = 0 : i64, tpu.core_type = #tpu.core_type<tc>, window_params = [{transform_indices = @transform_0, window_bounds = array<i64: 1, 256, 64>}, {pipeline_mode = #tpu.pipeline_mode<synchronous>, transform_indices = @transform_1, window_bounds = array<i64: 32, 256>}, {pipeline_mode = #tpu.pipeline_mode<synchronous>, transform_indices = @transform_2, window_bounds = array<i64: 32, 1>}, {transform_indices = @transform_3, window_bounds = array<i64: 1, 32, 64>}]} {
    %c0 = arith.constant 0 : index
    %c0_0 = arith.constant 0 : index
    %0 = vector.load %arg3[%c0, %c0_0] : memref<32x256xf32, #tpu.memory_space<vmem>>, vector<32x256xf32>
    %c0_1 = arith.constant 0 : index
    %c0_2 = arith.constant 0 : index
    %c0_3 = arith.constant 0 : index
    %1 = vector.load %arg2[%c0_1, %c0_2, %c0_3] : memref<1x256x64xf32, #tpu.memory_space<vmem>>, vector<1x256x64xf32>
    %2 = vector.shape_cast %1 : vector<1x256x64xf32> to vector<256x64xf32>
    %cst = arith.constant dense<0.000000e+00> : vector<32x64xf32>
    %3 = tpu.matmul %0, %2, %cst {dimension_numbers = #tpu.dot_dimension_numbers<[1], [0], [0], [1], [0, 0, 1, 1], [], []>} : vector<32x256xf32>, vector<256x64xf32>, vector<32x64xf32> -> vector<32x64xf32>
    %c0_4 = arith.constant 0 : index
    %c0_5 = arith.constant 0 : index
    %4 = vector.load %arg4[%c0_4, %c0_5] : memref<32x1xf32, #tpu.memory_space<vmem>>, vector<32x1xf32>
    %5 = vector.broadcast %4 : vector<32x1xf32> to vector<32x64xf32>
    %6 = arith.addf %3, %5 : vector<32x64xf32>
    %cst_6 = arith.constant 1.000000e-01 : f32
    %7 = vector.broadcast %cst_6 : f32 to vector<32x64xf32>
    %8 = arith.mulf %7, %6 : vector<32x64xf32>
    %9 = arith.maximumf %6, %8 : vector<32x64xf32>
    %c0_7 = arith.constant 0 : index
    %c0_8 = arith.constant 0 : index
    %c0_9 = arith.constant 0 : index
    %10 = vector.load %arg5[%c0_7, %c0_8, %c0_9] : memref<1x32x64xf32, #tpu.memory_space<vmem>>, vector<1x32x64xf32>
    %11 = vector.shape_cast %10 : vector<1x32x64xf32> to vector<32x64xf32>
    %12 = vector.shape_cast %9 : vector<32x64xf32> to vector<1x32x64xf32>
    tpu.vector_store %arg5[%c0_7, %c0_8, %c0_9], %12 {strides = array<i32>} : memref<1x32x64xf32, #tpu.memory_space<vmem>>, vector<1x32x64xf32>,
    return
  }
  func.func @transform_0(%arg0: i32, %arg1: i32) -> (i32, i32, i32) {
    %c0_i32 = arith.constant 0 : i32
    %c0_i32_0 = arith.constant 0 : i32
    return %arg0, %c0_i32, %arg1 : i32, i32, i32
  }
  func.func @transform_1(%arg0: i32, %arg1: i32) -> (i32, i32) {
    %c0_i32 = arith.constant 0 : i32
    %c0_i32_0 = arith.constant 0 : i32
    %c0_i32_1 = arith.constant 0 : i32
    return %c0_i32, %c0_i32_0 : i32, i32
  }
  func.func @transform_2(%arg0: i32, %arg1: i32) -> (i32, i32) {
    %c0_i32 = arith.constant 0 : i32
    %c0_i32_0 = arith.constant 0 : i32
    %c0_i32_1 = arith.constant 0 : i32
    return %c0_i32, %c0_i32_0 : i32, i32
  }
  func.func @transform_3(%arg0: i32, %arg1: i32) -> (i32, i32, i32) {
    %c0_i32 = arith.constant 0 : i32
    %c0_i32_0 = arith.constant 0 : i32
    return %arg0, %c0_i32, %arg1 : i32, i32, i32
  }
}

</mosaic_0001>

<bundles_post_ra>
// kernel: tpu_custom_call.1
= control target key start
LH: loop header
LB: loop body
LE: loop exit
PB: predicated region body
PF: predicated region fallthrough
CT: control target
= control target key end

     0   :  { %8 = vsyncpa [#allocation3], 0  ;;  %s913_s0 = inlined_call_operand.vmem [shape: f32[2,256,64], index: 0, kind: input, shape index: {}]   ;;  %s914_s1 = inlined_call_operand.vmem [shape: f32[32,256], index: 1, kind: input, shape index: {}]   ;;  %s915_s2 = inlined_call_operand.vmem [shape: f32[32,1], index: 2, kind: input, shape index: {}]   ;;  %s916_s3 = inlined_call_operand.hbm [shape: f32[2,32,64], index: 3, kind: output, shape index: {}]  }
   0x1   :  { %10 = vsyncpa [#allocation3 + $0x1], 0  ;;  %s720_s12 = smov 0   ;;  %s722_s13 = smov 0  }
   0x2   :  { %s724_s14 = smov 0   ;;  %s726_s15 = smov 0  }
   0x3   :  { %s728_s16 = smov 0   ;;  %s730_s17 = smov 0  }
   0x4 LB: > { %s449_s18 = sadd.s32 4294967295, %s694_s17   ;;  %s450_s19 = sadd.s32 4294967294, %s694_s17   ;;  %s694_s17 = sphi %s730_s17, %s16_s17   ;;  %s690_s16 = sphi %s728_s16, %s923_s16   ;;  %s686_s15 = sphi %s726_s15, %s922_s15   ;;  %s682_s14 = sphi %s724_s14, %s921_s14   ;;  %s678_s13 = sphi %s722_s13, %s920_s13   ;;  %s674_s12 = sphi %s720_s12, %s919_s12  }
   0x5   : > { %s28_s20 = sadd.s32 1, %s690_s16  ;;  %s107_s21 = sadd.s32 1, %s682_s14 }
   0x6   : > { %p30_p0 = scmp.ge.s32.totalorder %s28_s20, 2  ;;  %p117_p1 = scmp.ne.s32.totalorder %s682_s14, %s678_s13 }
   0x7   : > { %p118_p2 = scmp.eq.s32.totalorder %s449_s18, 1  ;;  %p123_p3 = scmp.ne.s32.totalorder %s678_s13, %s674_s12 }
   0x8   : > { %s925_s20 = smov (%p30_p0, %s28_s20), 0  ;;  %p124_p5 = scmp.eq.s32.totalorder %s450_s19, 1 }
   0x9   : > { %p760_p4 = por %p118_p2, %p117_p1  ;;  %s102_s23 = ssub.s32 %s690_s16, %s925_s20 }
   0xa   : > { %p453_p6 = scmp.ge.s32.totalorder %s694_s17, 1  ;;  %p105_p7 = scmp.eq.s32.totalorder %s102_s23, 0 }
   0xb   : > { %p767_p8 = por %p124_p5, %p123_p3  ;;  %p159_p9 = scmp.lt.s32.totalorder %s694_s17, 3 }
   0xc   : > { %s773_s25 = scalar_select %p105_p7, %s682_s14, %s107_s21  }
   0xd   : > { %p160_p10 = pnand %p453_p6, %p159_p9 }
   0xe   : > { %p186_p11 = scmp.lt.s32.totalorder (!%p160_p10), %s686_s15, 1  ;;  %v195_v0 = vld [vmem:[%s914_s1 + $0x8] sm:$0xff] (!%p160_p10)  ;;  %v696_v2 = vmov (!%p160_p10), 0   ;;  %v236_v3 = vld [vmem:[%s915_s2 + $0x10] sm:$0xff] (!%p160_p10)  ;;  %v234_v4 = vld [vmem:[%s915_s2] sm:$0xff] (!%p160_p10)  ;;  %s183_s11 = sand.u32 (!%p160_p10), 1, %s678_s13  }
   0xf   : > { %163 = sbr.rel (%p160_p10) target bundleno = 301 (0x12d), region = 32  ;;  %v199_v1 = vld [vmem:[%s914_s1 + $0x28] sm:$0xff] (!%p160_p10)  ;;  %322 = vmatprep.mubr.f32.mxu0 (!%p160_p10), %v195_v0  ;;  %615 = vset.pattern.permute.xlu1 (!%p160_p10), %v696_v2  ;;  %v237_v5 = vld [vmem:[%s915_s2 + $0x18] sm:$0xff] (!%p160_p10)  ;;  %v194_v55 = vld [vmem:[%s914_s1] sm:$0xff] (!%p160_p10)  ;;  %s454_s18 = sshll.u32 (!%p160_p10), %s183_s11, 5  ;;  %vm351_vm0 = vcmask (!%p160_p10), 523264  }
  0x10   : > { %332 = vmatprep.mubr.f32.mxu1 (!%p160_p10), %v199_v1  ;;  %614 = vset.pattern.permute.xlu0 (!%p160_p10), %v696_v2  ;;  %v235_v6 = vld [vmem:[%s915_s2 + $0x8] sm:$0xff] (!%p160_p10)  ;;  %v198_v56 = vld [vmem:[%s914_s1 + $0x20] sm:$0xff] (!%p160_p10)  ;;  %v197_v57 = vld [vmem:[%s914_s1 + $0x18] sm:$0xff] (!%p160_p10)  ;;  %s185_s21 = scalar_lea.vmem (!%p160_p10), [#allocation2], %s454_s18 }
  0x11   : > { %250 = vperm.xlu1 (!%p160_p10), %615, %v236_v3   ;;  %240 = vperm.xlu0 (!%p160_p10), %614, %v234_v4   ;;  %v201_v58 = vld [vmem:[%s914_s1 + $0x38] sm:$0xff] (!%p160_p10)  ;;  %v196_v59 = vld [vmem:[%s914_s1 + $0x10] sm:$0xff] (!%p160_p10)  ;;  %s371_s23 = sshll.u32 (!%p160_p10), %s185_s21, 4  ;;  %s861_s23 = int_to_ptr.vmem [resolvable:$true] %s371_s23 }
  0x12   : > { %v200_v60 = vld [vmem:[%s914_s1 + $0x30] sm:$0xff] (!%p160_p10)  ;;  %s616_s29 = scalar_lea.vmem (!%p160_p10), %s861_s23, 512 }
  0x13   : > { %p617_p12 = scmp.ne.s32.totalorder (!%p160_p10), %s861_s23, %s616_s29 }
  0x15   : > { %255 = vperm.xlu1 (!%p160_p10), %615, %v237_v5   ;;  %245 = vperm.xlu0 (!%p160_p10), %614, %v235_v6   ;;  %p618_p13 = pnand (!%p160_p10), %p617_p12, %p760_p4 }
  0x16   : > { %s187_s30 = scalar_select %p186_p11, %s686_s15, 1 }
  0x17   : > { %p619_p0 = pneg %p618_p13 }
  0x18   : > { %s462_s8 = sshll.u32 %s187_s30, 8  ;;  %s697_s30 = smov [#allocation2]  }
  0x19   : > { %s795_s19 = scalar_lea.vmem %s913_s0, %s462_s8  ;;  %s620_s4 = sshll.u32 %s697_s30, 4  ;;  %s621_s4 = int_to_ptr.vmem [resolvable:$false] %s620_s4 }
  0x1a   : > { %v218_v7 = vld [vmem:[%s795_s19 + $0x80] sm:$0xff]  ;;  %v219_v8 = vld [vmem:[%s795_s19 + $0x88] sm:$0xff]  ;;  %v220_v12 = vld [vmem:[%s795_s19 + $0x90] sm:$0xff]  ;;  %s622_s5 = scalar_lea.vmem %s621_s4, 1024  ;;  %p623_p1 = scmp.lt.s32.totalorder %s861_s23, %s621_s4 }
  0x1b   : > { %v202_v9 = vld [vmem:[%s795_s19] sm:$0xff]  ;;  %v508_v10 = vpack.c.bf16 %v219_v8, %v218_v7  ;;  %v203_v11 = vld [vmem:[%s795_s19 + $0x8] sm:$0xff]  ;;  %v221_v13 = vld [vmem:[%s795_s19 + $0x98] sm:$0xff]  ;;  %p624_p2 = scmp.lt.s32.totalorder %s622_s5, %s616_s29 }
  0x1c   : > { %v510_v14 = vpack.c.bf16 %v203_v11, %v202_v9  ;;  %v512_v15 = vpack.c.bf16 %v221_v13, %v220_v12  ;;  %v204_v16 = vld [vmem:[%s795_s19 + $0x10] sm:$0xff]  ;;  %v205_v17 = vld [vmem:[%s795_s19 + $0x18] sm:$0xff]  ;;  %v222_v18 = vld [vmem:[%s795_s19 + $0xa0] sm:$0xff] }
  0x1d   : > { %509 = vmatprep.subr.bf16.mxu0 %v508_v10  ;;  %540 = vmatprep.subr.bf16.mxu1 %v508_v10  ;;  %v223_v19 = vld [vmem:[%s795_s19 + $0xa8] sm:$0xff]  ;;  %v514_v20 = vpack.c.bf16 %v205_v17, %v204_v16  ;;  %v206_v22 = vld [vmem:[%s795_s19 + $0x20] sm:$0xff]  ;;  %v224_v24 = vld [vmem:[%s795_s19 + $0xb0] sm:$0xff]  ;;  %p625_p3 = por %p624_p2, %p623_p1 }
  0x1e   : > { %511 = vmatpush3.bf16.msra.mxu0 %v510_v14  ;;  %548 = vmatpush3.bf16.msra.mxu1 %v510_v14  ;;  %v516_v21 = vpack.c.bf16 %v223_v19, %v222_v18  ;;  %v207_v23 = vld [vmem:[%s795_s19 + $0x28] sm:$0xff]  ;;  %v225_v25 = vld [vmem:[%s795_s19 + $0xb8] sm:$0xff]  ;;  %v208_v28 = vld [vmem:[%s795_s19 + $0x30] sm:$0xff] }
  0x1f   : > { %513 = vmatprep.subr.bf16.mxu0 %v512_v15  ;;  %541 = vmatprep.subr.bf16.mxu1 %v512_v15  ;;  %v518_v26 = vpack.c.bf16 %v207_v23, %v206_v22  ;;  %v520_v27 = vpack.c.bf16 %v225_v25, %v224_v24  ;;  %v209_v29 = vld [vmem:[%s795_s19 + $0x38] sm:$0xff]  ;;  %v226_v30 = vld [vmem:[%s795_s19 + $0xc0] sm:$0xff]  ;;  %v227_v31 = vld [vmem:[%s795_s19 + $0xc8] sm:$0xff]  ;;  %p626_p5 = pnand %p625_p3, %p619_p0 }
  0x20   : > { %v522_v32 = vpack.c.bf16 %v209_v29, %v208_v28  ;;  %v524_v33 = vpack.c.bf16 %v227_v31, %v226_v30  ;;  %v210_v34 = vld [vmem:[%s795_s19 + $0x40] sm:$0xff]  ;;  %v211_v35 = vld [vmem:[%s795_s19 + $0x48] sm:$0xff]  ;;  %v228_v36 = vld [vmem:[%s795_s19 + $0xd0] sm:$0xff] }
  0x21   : > { %v229_v37 = vld [vmem:[%s795_s19 + $0xd8] sm:$0xff]  ;;  %v526_v38 = vpack.c.bf16 %v211_v35, %v210_v34  ;;  %v212_v40 = vld [vmem:[%s795_s19 + $0x50] sm:$0xff]  ;;  %v230_v42 = vld [vmem:[%s795_s19 + $0xe0] sm:$0xff] }
  0x22   : > { %515 = vmatpush3.bf16.msra.mxu0 %v514_v20  ;;  %549 = vmatpush3.bf16.msra.mxu1 %v514_v20  ;;  %v528_v39 = vpack.c.bf16 %v229_v37, %v228_v36  ;;  %v213_v41 = vld [vmem:[%s795_s19 + $0x58] sm:$0xff]  ;;  %v231_v43 = vld [vmem:[%s795_s19 + $0xe8] sm:$0xff]  ;;  %v214_v46 = vld [vmem:[%s795_s19 + $0x60] sm:$0xff] }
  0x23   : > { %517 = vmatprep.subr.bf16.mxu0 %v516_v21  ;;  %542 = vmatprep.subr.bf16.mxu1 %v516_v21  ;;  %v530_v44 = vpack.c.bf16 %v213_v41, %v212_v40  ;;  %v532_v45 = vpack.c.bf16 %v231_v43, %v230_v42  ;;  %v215_v47 = vld [vmem:[%s795_s19 + $0x68] sm:$0xff]  ;;  %v232_v48 = vld [vmem:[%s795_s19 + $0xf0] sm:$0xff]  ;;  %v233_v49 = vld [vmem:[%s795_s19 + $0xf8] sm:$0xff] }
  0x24   : > { %v534_v50 = vpack.c.bf16 %v215_v47, %v214_v46  ;;  %v536_v51 = vpack.c.bf16 %v233_v49, %v232_v48  ;;  %v216_v52 = vld [vmem:[%s795_s19 + $0x70] sm:$0xff]  ;;  %v217_v53 = vld [vmem:[%s795_s19 + $0x78] sm:$0xff]  ;;  %s463_s19 = sshll.u32 %s686_s15, 9  ;;  %s867_s15 = scalar_lea.sflag [#allocation3], %s183_s11 }
  0x25   : > { %v538_v54 = vpack.c.bf16 %v217_v53, %v216_v52  ;;  %s859_s28 = scalar_lea.hbm %s916_s3, %s463_s19 }
  0x26   : > { %519 = vmatpush3.bf16.msra.mxu0 %v518_v26  ;;  %550 = vmatpush3.bf16.msra.mxu1 %v518_v26 }
  0x27   : > { %521 = vmatprep.subr.bf16.mxu0 %v520_v27  ;;  %543 = vmatprep.subr.bf16.mxu1 %v520_v27 }
  0x2a   : > { %523 = vmatpush3.bf16.msra.mxu0 %v522_v32  ;;  %551 = vmatpush3.bf16.msra.mxu1 %v522_v32 }
  0x2b   : > { %525 = vmatprep.subr.bf16.mxu0 %v524_v33  ;;  %544 = vmatprep.subr.bf16.mxu1 %v524_v33 }
  0x2e   : > { %527 = vmatpush3.bf16.msra.mxu0 %v526_v38  ;;  %552 = vmatpush3.bf16.msra.mxu1 %v526_v38 }
  0x2f   : > { %529 = vmatprep.subr.bf16.mxu0 %v528_v39  ;;  %545 = vmatprep.subr.bf16.mxu1 %v528_v39 }
  0x32   : > { %531 = vmatpush3.bf16.msra.mxu0 %v530_v44  ;;  %553 = vmatpush3.bf16.msra.mxu1 %v530_v44 }
  0x33   : > { %533 = vmatprep.subr.bf16.mxu0 %v532_v45  ;;  %546 = vmatprep.subr.bf16.mxu1 %v532_v45 }
  0x36   : > { %535 = vmatpush3.bf16.msra.mxu0 %v534_v50  ;;  %554 = vmatpush3.bf16.msra.mxu1 %v534_v50 }
  0x37   : > { %537 = vmatprep.subr.bf16.mxu0 %v536_v51  ;;  %547 = vmatprep.subr.bf16.mxu1 %v536_v51 }
  0x3a   : > { %539 = vmatpush3.bf16.msra.mxu0 %v538_v54  ;;  %555 = vmatpush3.bf16.msra.mxu1 %v538_v54 }
  0x3d   : > { %323 = vmatmul.mubr.f32.vlgmr.msra.gmra.mrb[0].mxu0 %v194_v55  ;;  %333 = vmatmul.mubr.f32.vlgmr.msra.gmra.mrb[0].mxu1 %v198_v56 }
  0x3e   : > { %327 = vmatprep.mubr.f32.mxu0 %v197_v57  ;;  %337 = vmatprep.mubr.f32.mxu1 %v201_v58 }
  0x41   : > { %328 = vmatmul.mubr.f32.gmra.mrb[2].mxu0 %v196_v59  ;;  %338 = vmatmul.mubr.f32.gmra.mrb[2].mxu1 %v200_v60 }
  0x90   : > { %v251_v61 = vpop.permute.xlu1 %250  ;;  %v241_v62 = vpop.permute.xlu0 %240 }
  0x94   : > { %v256_v15 = vpop.permute.xlu1 %255  ;;  %v246_v16 = vpop.permute.xlu0 %245 }
 0x110   : > { %v496_v63 = vpop.f32.mrb[0].mxu0  ;;  %v502_v0 = vpop.f32.mrb[0].mxu1 }
 0x111   : > { %v497_v1 = vpop.f32.mrb[1].mxu0  ;;  %v503_v2 = vpop.f32.mrb[1].mxu1 }
 0x112   : > { %v498_v3 = vadd.f32 %v497_v1, %v496_v63  ;;  %v504_v4 = vadd.f32 %v503_v2, %v502_v0 }
 0x114   : > { %v325_v5 = vadd.f32 %v498_v3, %v241_v62  ;;  %v335_v6 = vadd.f32 %v504_v4, %v251_v61  ;;  %v499_v7 = vpop.f32.mrb[2].mxu0  ;;  %v505_v8 = vpop.f32.mrb[2].mxu1 }
 0x115   : > { %v500_v9 = vpop.f32.mrb[3].mxu0  ;;  %v506_v10 = vpop.f32.mrb[3].mxu1 }
 0x116   : > { %v343_v11 = vmul.f32 0.1, %v325_v5  ;;  %v345_v12 = vmul.f32 0.1, %v335_v6  ;;  %v501_v13 = vadd.f32 %v500_v9, %v499_v7  ;;  %v507_v14 = vadd.f32 %v506_v10, %v505_v8 }
 0x118   : > { %v347_v17 = vmax.f32 %v325_v5, %v343_v11  ;;  %v349_v18 = vmax.f32 %v335_v6, %v345_v12  ;;  %v330_v19 = vadd.f32 %v501_v13, %v246_v16  ;;  %v340_v20 = vadd.f32 %v507_v14, %v256_v15 }
 0x11a   : > { %352 = vst.msk [vmem:[%s185_s21] sm:$0xff] %vm351_vm0, %v347_v17  ;;  %354 = vst.msk [vmem:[%s185_s21 + $0x10] sm:$0xff] %vm351_vm0, %v349_v18  ;;  %v344_v21 = vmul.f32 0.1, %v330_v19  ;;  %v346_v22 = vmul.f32 0.1, %v340_v20 }
 0x11c   : > { %v348_v23 = vmax.f32 %v330_v19, %v344_v21  ;;  %v350_v24 = vmax.f32 %v340_v20, %v346_v22 }
 0x11e   : > { %353 = vst.msk [vmem:[%s185_s21 + $0x8] sm:$0xff] %vm351_vm0, %v348_v23  ;;  %355 = vst.msk [vmem:[%s185_s21 + $0x18] sm:$0xff] %vm351_vm0, %v350_v24 }
 0x11f   : > { %629 = shalt.err (!%p626_p5)
}
 0x120   : > { %s630_s6 = scalar_lea.hbm %s859_s28, 512  ;;  %s634_s9 = scalar_lea.hbm %s916_s3, 1024 }
 0x121   : > { %p631_p6 = scmp.ne.s32.totalorder %s859_s28, %s630_s6  ;;  %p635_p10 = scmp.lt.u32.totalorder %s859_s28, %s916_s3 }
 0x122   : > { %p636_p11 = scmp.lt.u32.totalorder %s634_s9, %s630_s6  ;;  %p638_p13 = scmp.lt.u32.totalorder %s630_s6, %s859_s28 }
 0x123   : > { %p632_p7 = pnand %p631_p6, %p760_p4 }
 0x124   : > { %p637_p12 = por %p636_p11, %p635_p10 }
 0x125   : > { %p633_p9 = pneg %p632_p7 }
 0x126   : > { %p639_p0 = por %p638_p13, %p637_p12 }
 0x128   : > { %p640_p1 = pnand %p639_p0, %p633_p9 }
 0x12a   : > { %643 = shalt.err (!%p640_p1)
}
 0x12b   : > { %s698_s18 = smov 128   ;;  %s699_s19 = smov 8  }
 0x12c   : > { %556 = dma.vmem_to_hbm [thread:$0]  (%p760_p4), %s861_s23, 512, %s859_s28, %s867_s15, %s698_s18, %s698_s18, %s699_s19  }
 0x12d PF: > { %p562_p2 = scmp.ge.s32.totalorder %s694_s17, 2  ;;  %s386_s21 = sand.u32 1, %s674_s12  }
 0x12e   : > { %s387_s26 = scalar_lea.sflag [#allocation3], %s386_s21 }
 0x12f   : > { %p559_p3 = pnand %p562_p2, %p767_p8 }
 0x131   : > { %669 = dma.done.wait (!%p559_p3), %s387_s26, 512  }
 0x132   : > { %671 = vsyncadd (!%p559_p3), %s387_s26, 4294966784  ;;  %s16_s17 = sadd.s32 1, %s694_s17   ;;  %s919_s12 = smov %s678_s13 }
 0x133   : > { %p13_p5 = scmp.ge.s32.totalorder %s16_s17, 4   ;;  %s920_s13 = smov %s682_s14 }
 0x134   : > { %s921_s14 = smov %s773_s25  ;;  %s922_s15 = smov %s690_s16 }
 0x135   : > { %s923_s16 = smov %s925_s20  ;;  %15 = sbr.rel (!%p13_p5) target bundleno = 4 (0x4), region = 67 }
 0x13c   :  { %392 = vsyncpa [#allocation3], 1 }
 0x13d   :  { %394 = vsyncpa [#allocation3 + $0x1], 1 }

</bundles_post_ra>
